<compile_context>
chip_gen: v7x
topology: tpu7x:2x2x1
jax: 0.10.0
libtpu: 0.0.40
codegen_flags: <defaults>
</compile_context>

<pallas_src>
import functools

import jax
import jax.numpy as jnp
from jax.experimental import pallas as pl
from jax.experimental.pallas import tpu as pltpu


def _f1_counts_kernel(logits_ref, labels_ref, counts_ref, *, total_n, tile_n,
                      tiles_per_split):
    """Accumulates per-class [tp, pred_count, true_count] over batch tiles.

    logits_ref: (TILE_N, C) native dtype  - raw predictions tile
    labels_ref: (TILE_N, 1) int32         - integer class labels tile
    counts_ref: (3, C) int32              - resident accumulator for this split
    """
    p = pl.program_id(0)   # parallel partial-sum split
    i = pl.program_id(1)   # batch tile within split (reduction axis)

    @pl.when(i == 0)
    def _():
        counts_ref[...] = jnp.zeros_like(counts_ref)

    logits = logits_ref[...]                       # (TILE_N, C), native dtype
    labels = labels_ref[...]                       # (TILE_N, 1) int32
    rows, c = logits.shape

    class_ids = jax.lax.broadcasted_iota(jnp.int32, (rows, c), 1)
    row_base = (p * tiles_per_split + i) * tile_n
    row_ids = jax.lax.broadcasted_iota(jnp.int32, (rows, c), 0) + row_base
    valid = row_ids < total_n                      # mask padded rows of ragged tile

    # argmax over classes, first-occurrence tie-break (matches torch.argmax).
    max_val = jnp.max(logits, axis=1, keepdims=True)
    is_max = logits == max_val
    pred_idx = jnp.min(jnp.where(is_max, class_ids, c), axis=1, keepdims=True)

    y_pred_oh = (valid & (class_ids == pred_idx)).astype(jnp.float32)
    y_true_oh = (valid & (class_ids == labels)).astype(jnp.float32)

    # Batch-axis reductions as ones-row matmuls (MXU) instead of XLU axis-0 sums.
    ones_row = jnp.ones((1, rows), jnp.float32)
    tp = jnp.dot(ones_row, y_true_oh * y_pred_oh, preferred_element_type=jnp.float32)
    pred_cnt = jnp.dot(ones_row, y_pred_oh, preferred_element_type=jnp.float32)
    true_cnt = jnp.dot(ones_row, y_true_oh, preferred_element_type=jnp.float32)

    tile_counts = jnp.concatenate([tp, pred_cnt, true_cnt], axis=0)   # (3, C) f32
    counts_ref[...] += tile_counts.astype(jnp.int32)                  # exact int accum


def f1_counts(y_pred, y_true, num_classes, tile_n=1024):
    """Pallas call producing the (3, num_classes) int32 [tp, pred_count, true_count]."""
    n, c = y_pred.shape
    assert c == num_classes
    assert y_true.shape == (n,)

    # Tile sizing: full extent if it fits, otherwise a multiple of 8 (sublane rule).
    if tile_n >= n:
        tile_n = n
    else:
        tile_n = max(8, (tile_n // 8) * 8)
    tiles = -(-n // tile_n)

    # Split the batch into 2 parallel partial sums when it divides evenly
    # (lets v7x's 2 TensorCores each own half; harmless on 1-TC chips).
    num_partials = 2 if (tiles >= 2 and tiles % 2 == 0) else 1
    tiles_per_split = tiles // num_partials

    labels_2d = y_true.astype(jnp.int32).reshape(n, 1)

    kernel = functools.partial(
        _f1_counts_kernel,
        total_n=n, tile_n=tile_n, tiles_per_split=tiles_per_split)

    partials = pl.pallas_call(
        kernel,
        out_shape=jax.ShapeDtypeStruct((num_partials, 3, num_classes), jnp.int32),
        grid_spec=pltpu.PrefetchScalarGridSpec(
            num_scalar_prefetch=0,
            grid=(num_partials, tiles_per_split),
            in_specs=[
                pl.BlockSpec((tile_n, c),
                             lambda p, i: (p * tiles_per_split + i, 0)),
                pl.BlockSpec((tile_n, 1),
                             lambda p, i: (p * tiles_per_split + i, 0)),
            ],
            out_specs=pl.BlockSpec((None, 3, c), lambda p, i: (p, 0, 0)),
        ),
        compiler_params=pltpu.CompilerParams(
            dimension_semantics=("parallel", "arbitrary")),
    )(y_pred, labels_2d)                      # native dtype DMA (no wrapper upcast)

    return partials.sum(axis=0)               # (3, C) int32


@functools.partial(jax.jit, static_argnames=("num_classes",))
def _f1_metrics(counts, total_n, num_classes, epsilon):
    """On-device epilogue: derive fp/fn/tn and the four metrics (x100)."""
    counts = counts.astype(jnp.float32)
    tp, pred_cnt, true_cnt = counts[0], counts[1], counts[2]
    fp = pred_cnt - tp
    fn = true_cnt - tp
    tn = total_n - tp - fp - fn

    precision = tp / (tp + fp + epsilon)
    recall = tp / (tp + fn + epsilon)
    accuracy = tp.sum() / (tp.sum() + tn.sum() + fp.sum() + fn.sum())
    accuracy = accuracy * num_classes
    f1 = 2.0 * (precision * recall) / (precision + recall + epsilon)
    return jnp.stack([accuracy * 100.0,
                      precision.mean() * 100.0,
                      recall.mean() * 100.0,
                      f1.mean() * 100.0])


def f1_score_forward(y_pred, y_true, num_classes, epsilon=1e-07, tile_n=1024):
    """Mirrors F1_score.forward() from a zeroed state. One host sync total."""
    assert y_pred.ndim == 2
    assert y_true.ndim == 1
    counts = f1_counts(y_pred, y_true, num_classes, tile_n=tile_n)
    metrics = _f1_metrics(counts, jnp.float32(y_pred.shape[0]), num_classes, epsilon)
    acc, prec, rec, f1 = jax.device_get(metrics)
    return float(acc), float(prec), float(rec), float(f1)


# ---------------------------------------------------------------------------
# Pure-JAX references for verification.
# ---------------------------------------------------------------------------
def _reference_counts(y_pred, y_true, num_classes):
    yt = jax.nn.one_hot(y_true, num_classes, dtype=jnp.float32)
    yp = jax.nn.one_hot(jnp.argmax(y_pred, axis=1), num_classes, dtype=jnp.float32)
    tp = (yt * yp).sum(0)
    return jnp.stack([tp, yp.sum(0), yt.sum(0)], axis=0).astype(jnp.int32)


def _reference_forward(y_pred, y_true, num_classes, epsilon=1e-07):
    yt = jax.nn.one_hot(y_true, num_classes, dtype=jnp.float32)
    yp = jax.nn.one_hot(jnp.argmax(y_pred, axis=1), num_classes, dtype=jnp.float32)
    tp = (yt * yp).sum(0)
    tn = ((1 - yt) * (1 - yp)).sum(0)
    fp = ((1 - yt) * yp).sum(0)
    fn = (yt * (1 - yp)).sum(0)
    precision = tp / (tp + fp + epsilon)
    recall = tp / (tp + fn + epsilon)
    accuracy = tp.sum() / (tp.sum() + tn.sum() + fp.sum() + fn.sum()) * num_classes
    f1 = 2 * (precision * recall) / (precision + recall + epsilon)
    return (float(accuracy) * 100.0, float(precision.mean()) * 100.0,
            float(recall.mean()) * 100.0, float(f1.mean()) * 100.0)


if __name__ == "__main__":
    num_classes = 10
    key = jax.random.PRNGKey(0)

    # --- Test A: small single-tile f32 case (matches module's expected usage) ---
    k1, k2, k3, k4, k5, k6 = jax.random.split(key, 6)
    batch_a = 16
    y_pred_a = jax.random.normal(k1, (batch_a, num_classes), dtype=jnp.float32)
    y_true_a = jax.random.randint(k2, (batch_a,), 0, num_classes, dtype=jnp.int32)

    counts_a = f1_counts(y_pred_a, y_true_a, num_classes)
    jax.block_until_ready(counts_a)
    assert jnp.array_equal(counts_a, _reference_counts(y_pred_a, y_true_a, num_classes))

    out_a = f1_score_forward(y_pred_a, y_true_a, num_classes)
    ref_a = _reference_forward(y_pred_a, y_true_a, num_classes)
    assert all(abs(o - r) < 1e-3 for o, r in zip(out_a, ref_a)), (out_a, ref_a)

    # --- Test B: multi-tile + ragged last tile, bf16 logits (native-dtype DMA) ---
    batch_b = 300
    y_pred_b = jax.random.normal(k3, (batch_b, num_classes), dtype=jnp.bfloat16)
    y_true_b = jax.random.randint(k4, (batch_b,), 0, num_classes, dtype=jnp.int32)
    counts_b = f1_counts(y_pred_b, y_true_b, num_classes, tile_n=128)
    jax.block_until_ready(counts_b)
    assert jnp.array_equal(counts_b, _reference_counts(y_pred_b, y_true_b, num_classes))

    # --- Test C: even tile count -> exercises the 2-way parallel partial-sum path ---
    batch_c = 512
    y_pred_c = jax.random.normal(k5, (batch_c, num_classes), dtype=jnp.float32)
    y_true_c = jax.random.randint(k6, (batch_c,), 0, num_classes, dtype=jnp.int32)
    counts_c = f1_counts(y_pred_c, y_true_c, num_classes, tile_n=128)
    jax.block_until_ready(counts_c)
    assert jnp.array_equal(counts_c, _reference_counts(y_pred_c, y_true_c, num_classes))

    out_c = f1_score_forward(y_pred_c, y_true_c, num_classes, tile_n=128)
    ref_c = _reference_forward(y_pred_c, y_true_c, num_classes)
    assert all(abs(o - r) < 1e-3 for o, r in zip(out_c, ref_c)), (out_c, ref_c)

    print("KERNEL_OK")
</pallas_src>

<mosaic_0001>
module attributes {stable_mosaic.version = 11 : i64} {
  func.func @_f1_counts_kernel(%arg0: i32, %arg1: i32, %arg2: memref<16x10xf32, #tpu.memory_space<vmem>>, %arg3: memref<16x1xi32, #tpu.memory_space<vmem>>, %arg4: memref<1x3x10xi32, #tpu.memory_space<vmem>>) attributes {dimension_semantics = [#tpu.dimension_semantics<parallel>, #tpu.dimension_semantics<arbitrary>], iteration_bounds = array<i64: 1, 1>, scalar_prefetch = 0 : i64, scratch_operands = 0 : i64, tpu.core_type = #tpu.core_type<tc>, window_params = [{transform_indices = @transform_0, window_bounds = array<i64: 16, 10>}, {transform_indices = @transform_1, window_bounds = array<i64: 16, 1>}, {transform_indices = @transform_2, window_bounds = array<i64: 1, 3, 10>}]} {
    %c0_i32 = arith.constant 0 : i32
    %0 = arith.cmpi eq, %arg1, %c0_i32 : i32
    %1 = arith.extui %0 : i1 to i32
    %c0_i32_0 = arith.constant 0 : i32
    %2 = arith.cmpi ne, %1, %c0_i32_0 : i32
    scf.if %2 {
      %c0_i32_16 = arith.constant 0 : i32
      %45 = vector.broadcast %c0_i32_16 : i32 to vector<3x10xi32>
      %c0_17 = arith.constant 0 : index
      %c0_18 = arith.constant 0 : index
      %c0_19 = arith.constant 0 : index
      %46 = vector.load %arg4[%c0_17, %c0_18, %c0_19] : memref<1x3x10xi32, #tpu.memory_space<vmem>>, vector<1x3x10xi32>
      %47 = vector.shape_cast %46 : vector<1x3x10xi32> to vector<3x10xi32>
      %48 = vector.shape_cast %45 : vector<3x10xi32> to vector<1x3x10xi32>
      tpu.vector_store %arg4[%c0_17, %c0_18, %c0_19], %48 {strides = array<i32>} : memref<1x3x10xi32, #tpu.memory_space<vmem>>, vector<1x3x10xi32>,
    } else {
    }
    %c0 = arith.constant 0 : index
    %c0_1 = arith.constant 0 : index
    %3 = vector.load %arg2[%c0, %c0_1] : memref<16x10xf32, #tpu.memory_space<vmem>>, vector<16x10xf32>
    %c0_2 = arith.constant 0 : index
    %c0_3 = arith.constant 0 : index
    %4 = vector.load %arg3[%c0_2, %c0_3] : memref<16x1xi32, #tpu.memory_space<vmem>>, vector<16x1xi32>
    %5 = tpu.iota {dimensions = array<i32: 1>} : vector<16x10xi32>
    %c1_i32 = arith.constant 1 : i32
    %6 = arith.muli %arg0, %c1_i32 : i32
    %7 = arith.addi %6, %arg1 : i32
    %c16_i32 = arith.constant 16 : i32
    %8 = arith.muli %7, %c16_i32 : i32
    %9 = tpu.iota {dimensions = array<i32: 0>} : vector<16x10xi32>
    %10 = vector.broadcast %8 : i32 to vector<16x10xi32>
    %11 = arith.addi %9, %10 : vector<16x10xi32>
    %c16_i32_4 = arith.constant 16 : i32
    %12 = vector.broadcast %c16_i32_4 : i32 to vector<16x10xi32>
    %13 = arith.cmpi slt, %11, %12 : vector<16x10xi32>
    %cst = arith.constant dense<0xFF800000> : vector<16xf32>
    %14 = vector.multi_reduction <maximumf>, %3, %cst [1] : vector<16x10xf32> to vector<16xf32>
    %15 = vector.shape_cast %14 : vector<16xf32> to vector<16x1xf32>
    %16 = vector.broadcast %15 : vector<16x1xf32> to vector<16x10xf32>
    %17 = arith.cmpf oeq, %3, %16 : vector<16x10xf32>
    %c10_i32 = arith.constant 10 : i32
    %18 = vector.broadcast %c10_i32 : i32 to vector<16x10xi32>
    %19 = arith.select %17, %5, %18 : vector<16x10xi1>, vector<16x10xi32>
    %cst_5 = arith.constant dense<2147483647> : vector<16xi32>
    %20 = vector.multi_reduction <minsi>, %19, %cst_5 [1] : vector<16x10xi32> to vector<16xi32>
    %21 = vector.shape_cast %20 : vector<16xi32> to vector<16x1xi32>
    %22 = vector.broadcast %21 : vector<16x1xi32> to vector<16x10xi32>
    %23 = arith.cmpi eq, %5, %22 : vector<16x10xi32>
    %24 = arith.andi %13, %23 : vector<16x10xi1>
    %25 = arith.extui %24 : vector<16x10xi1> to vector<16x10xi32>
    %26 = arith.sitofp %25 : vector<16x10xi32> to vector<16x10xf32>
    %27 = vector.broadcast %4 : vector<16x1xi32> to vector<16x10xi32>
    %28 = arith.cmpi eq, %5, %27 : vector<16x10xi32>
    %29 = arith.andi %13, %28 : vector<16x10xi1>
    %30 = arith.extui %29 : vector<16x10xi1> to vector<16x10xi32>
    %31 = arith.sitofp %30 : vector<16x10xi32> to vector<16x10xf32>
    %cst_6 = arith.constant 1.000000e+00 : f32
    %32 = vector.broadcast %cst_6 : f32 to vector<1x16xf32>
    %33 = arith.mulf %31, %26 : vector<16x10xf32>
    %cst_7 = arith.constant dense<0.000000e+00> : vector<1x10xf32>
    %34 = tpu.matmul %32, %33, %cst_7 {dimension_numbers = #tpu.dot_dimension_numbers<[1], [0], [0], [1], [0, 0, 1, 1], [], []>} : vector<1x16xf32>, vector<16x10xf32>, vector<1x10xf32> -> vector<1x10xf32>
    %cst_8 = arith.constant dense<0.000000e+00> : vector<1x10xf32>
    %35 = tpu.matmul %32, %26, %cst_8 {dimension_numbers = #tpu.dot_dimension_numbers<[1], [0], [0], [1], [0, 0, 1, 1], [], []>} : vector<1x16xf32>, vector<16x10xf32>, vector<1x10xf32> -> vector<1x10xf32>
    %cst_9 = arith.constant dense<0.000000e+00> : vector<1x10xf32>
    %36 = tpu.matmul %32, %31, %cst_9 {dimension_numbers = #tpu.dot_dimension_numbers<[1], [0], [0], [1], [0, 0, 1, 1], [], []>} : vector<1x16xf32>, vector<16x10xf32>, vector<1x10xf32> -> vector<1x10xf32>
    %37 = tpu.concatenate %34, %35, %36 in 0 : vector<1x10xf32>, vector<1x10xf32>, vector<1x10xf32> -> vector<3x10xf32>
    %c0_10 = arith.constant 0 : index
    %c0_11 = arith.constant 0 : index
    %c0_12 = arith.constant 0 : index
    %38 = vector.load %arg4[%c0_10, %c0_11, %c0_12] : memref<1x3x10xi32, #tpu.memory_space<vmem>>, vector<1x3x10xi32>
    %39 = vector.shape_cast %38 : vector<1x3x10xi32> to vector<3x10xi32>
    %40 = arith.fptosi %37 : vector<3x10xf32> to vector<3x10xi32>
    %41 = arith.addi %39, %40 : vector<3x10xi32>
    %c0_13 = arith.constant 0 : index
    %c0_14 = arith.constant 0 : index
    %c0_15 = arith.constant 0 : index
    %42 = vector.load %arg4[%c0_13, %c0_14, %c0_15] : memref<1x3x10xi32, #tpu.memory_space<vmem>>, vector<1x3x10xi32>
    %43 = vector.shape_cast %42 : vector<1x3x10xi32> to vector<3x10xi32>
    %44 = vector.shape_cast %41 : vector<3x10xi32> to vector<1x3x10xi32>
    tpu.vector_store %arg4[%c0_13, %c0_14, %c0_15], %44 {strides = array<i32>} : memref<1x3x10xi32, #tpu.memory_space<vmem>>, vector<1x3x10xi32>,
    return
  }
  func.func @transform_0(%arg0: i32, %arg1: i32) -> (i32, i32) {
    %c1_i32 = arith.constant 1 : i32
    %0 = arith.muli %arg0, %c1_i32 : i32
    %1 = arith.addi %0, %arg1 : i32
    %c0_i32 = arith.constant 0 : i32
    %c0_i32_0 = arith.constant 0 : i32
    return %1, %c0_i32 : i32, i32
  }
  func.func @transform_1(%arg0: i32, %arg1: i32) -> (i32, i32) {
    %c1_i32 = arith.constant 1 : i32
    %0 = arith.muli %arg0, %c1_i32 : i32
    %1 = arith.addi %0, %arg1 : i32
    %c0_i32 = arith.constant 0 : i32
    %c0_i32_0 = arith.constant 0 : i32
    return %1, %c0_i32 : i32, i32
  }
  func.func @transform_2(%arg0: i32, %arg1: i32) -> (i32, i32, i32) {
    %c0_i32 = arith.constant 0 : i32
    %c0_i32_0 = arith.constant 0 : i32
    %c0_i32_1 = arith.constant 0 : i32
    return %arg0, %c0_i32, %c0_i32_0 : i32, i32, i32
  }
}

</mosaic_0001>

<bundles_post_ra>
// kernel: tpu_custom_call.1
= control target key start
LH: loop header
LB: loop body
LE: loop exit
PB: predicated region body
PF: predicated region fallthrough
CT: control target
= control target key end

     0   :  { %vm77_vm0 = vcmask 80896   ;;  %v65_v4 = vlaneseq  ;;  %vm59_vm3 = vcmask 75776   ;;  %v447_v16 = vmov 0   ;;  %s514_s0 = inlined_call_operand.vmem [shape: f32[16,10], index: 0, kind: input, shape index: {}]   ;;  %s515_s2 = inlined_call_operand.vmem [shape: s32[1,3,10], index: 2, kind: output, shape index: {}]   ;;  %s516_s1 = inlined_call_operand.vmem [shape: s32[16,1], index: 1, kind: input, shape index: {}]  }
   0x1   :  { %v61_v0 = vld [vmem:[%s514_s0] sm:$0xff]  ;;  %v62_v1 = vld [vmem:[%s514_s0 + $0x8] sm:$0xff]  ;;  %446 = vset.pattern.permute.xlu1 %v447_v16  ;;  %60 = vst.msk [vmem:[%s515_s2] sm:$0x7] %vm59_vm3, %v447_v16  ;;  %445 = vset.pattern.permute.xlu0 %v447_v16  ;;  %v448_v27 = vmov 0.0|0.0   ;;  %vm449_vm6 = vmmov 0  }
   0x2   :  { %v78_v2 = vsel %vm77_vm0, %v61_v0, -inf  ;;  %v81_v3 = vsel %vm77_vm0, %v62_v1, -inf  ;;  %v476_v5 = vand.u32 127, %v65_v4  ;;  %v64_v25 = vld [vmem:[%s516_s1 + $0x8] sm:$0xff]  ;;  %v63_v26 = vld [vmem:[%s516_s1] sm:$0xff]  ;;  %431 = vmatprep.subr.bf16.mxu1 %v448_v27  ;;  %428 = vmatprep.subr.bf16.mxu0 %v448_v27  ;;  %v450_v28 = vmov 0.0  }
   0x3   :  { %79 = vmax.xlane.f32.xlu0 %v78_v2  ;;  %418 = vmatprep.mubr.msk.f32.mxu1 %vm449_vm6, %v450_v28  ;;  %v451_v47 = vmov 1.0|1.0   ;;  %vm142_vm12 = vcmask 130048   ;;  %v452_v49 = vmov 1.0   ;;  %vm362_vm14 = vcmask 1040384  }
   0x4   :  { %411 = vmatprep.mubr.msk.f32.mxu0 %vm449_vm6, %v450_v28  ;;  %vm364_vm15 = vcmask 1041408  }
   0x7   :  { %82 = vmax.xlane.f32.xlu0 %v81_v3 }
   0x8   :  { %v366_v61 = vld [vmem:[%s515_s2] sm:$0x7] }
  0x90   :  { %v80_v6 = vpop.xlane.xlu0 %79 }
  0x91   :  { %vm84_vm1 = vcmp.eq.f32.partialorder %v61_v0, %v80_v6 }
  0x92   :  { %v86_v7 = vsel %vm84_vm1, %v476_v5, 10 }
  0x93   :  { %v88_v8 = vsel %vm77_vm0, %v86_v7, 2147483647 }
  0x94   :  { %v83_v9 = vpop.xlane.xlu0 %82  ;;  %v90_v10 = vshra.s32 %v88_v8, 16  ;;  %v89_v17 = vand.u32 65535, %v88_v8 }
  0x95   :  { %vm85_vm2 = vcmp.eq.f32.partialorder %v62_v1, %v83_v9 }
  0x96   :  { %v87_v11 = vsel %vm85_vm2, %v476_v5, 10  ;;  %v92_v12 = vcvt.s32.f32 %v90_v10  ;;  %v91_v19 = vcvt.s32.f32 %v89_v17 }
  0x97   :  { %v103_v13 = vsel %vm77_vm0, %v87_v11, 2147483647 }
  0x98   :  { %93 = vmin.xlane.f32.xlu1 %v92_v12  ;;  %v105_v14 = vshra.s32 %v103_v13, 16  ;;  %v104_v20 = vand.u32 65535, %v103_v13 }
  0x9a   :  { %v107_v15 = vcvt.s32.f32 %v105_v14  ;;  %v106_v23 = vcvt.s32.f32 %v104_v20 }
  0x9c   :  { %108 = vmin.xlane.f32.xlu1 %v107_v15 }
 0x125   :  { %v94_v18 = vpop.xlane.xlu1 %93 }
 0x126   :  { %vm95_vm4 = vcmp.eq.f32.partialorder %v92_v12, %v94_v18  ;;  %v100_v29 = vcvt.f32.s32 %v94_v18 }
 0x127   :  { %v96_v21 = vsel %vm95_vm4, %v91_v19, inf }
 0x128   :  { %97 = vmin.xlane.f32.xlu0 %v96_v21  ;;  %v101_v31 = vshll.u32 %v100_v29, 16 }
 0x129   :  { %v109_v22 = vpop.xlane.xlu1 %108 }
 0x12a   :  { %vm110_vm5 = vcmp.eq.f32.partialorder %v107_v15, %v109_v22  ;;  %v115_v32 = vcvt.f32.s32 %v109_v22 }
 0x12b   :  { %v111_v24 = vsel %vm110_vm5, %v106_v23, inf }
 0x12c   :  { %112 = vmin.xlane.f32.xlu1 %v111_v24  ;;  %v116_v36 = vshll.u32 %v115_v32, 16 }
 0x13d   :  { %130 = vperm.xlu1 %446, %v64_v25  }
 0x13e   :  { %127 = vperm.xlu0 %445, %v63_v26  }
 0x1b5   :  { %v98_v30 = vpop.xlane.xlu0 %97 }
 0x1b6   :  { %v99_v33 = vcvt.f32.s32 %v98_v30 }
 0x1b8   :  { %v102_v34 = vadd.s32 %v101_v31, %v99_v33 }
 0x1b9   :  { %v113_v35 = vpop.xlane.xlu1 %112 }
 0x1ba   :  { %v114_v37 = vcvt.f32.s32 %v113_v35  ;;  %vm118_vm7 = vcmp.eq.s32.totalorder %v476_v5, %v102_v34 }
 0x1bb   :  { %v387_v43 = vsel %vm118_vm7, 1.0, %v450_v28 }
 0x1bc   :  { %v117_v38 = vadd.s32 %v116_v36, %v114_v37 }
 0x1bd   :  { %v131_v39 = vpop.permute.xlu1 %130  ;;  %v128_v40 = vpop.permute.xlu0 %127 }
 0x1be   :  { %vm119_vm8 = vcmp.eq.s32.totalorder %v476_v5, %v117_v38  ;;  %vm133_vm9 = vcmp.eq.s32.totalorder %v476_v5, %v131_v39  ;;  %vm132_vm10 = vcmp.eq.s32.totalorder %v476_v5, %v128_v40 }
 0x1bf   :  { %v388_v41 = vsel %vm119_vm8, 1.0, %v450_v28  ;;  %v390_v42 = vsel %vm133_vm9, 1.0, %v450_v28  ;;  %v389_v44 = vsel %vm132_vm10, 1.0, %v450_v28  ;;  %vm432_vm11 = vmpackc.low %vm119_vm8, %vm118_vm7 }
 0x1c0   :  { %v141_v45 = vmul.f32 %v390_v42, %v388_v41  ;;  %v140_v46 = vmul.f32 %v389_v44, %v387_v43  ;;  %433 = vmatpush3.bf16.msk.msra.mxu1 %vm432_vm11, %v451_v47  ;;  %vm435_vm13 = vmpackc.low %vm133_vm9, %vm132_vm10 }
 0x1c2   :  { %v429_v48 = vpack.c.bf16 %v141_v45, %v140_v46 }
 0x1c3   :  { %419 = vmatmul.mubr.msk.f32.vlgmr.msra.gmra.mrb[0].mxu1 %vm142_vm12, %v452_v49 }
 0x1c4   :  { %430 = vmatpush3.bf16.msra.mxu0 %v429_v48 }
 0x1c5   :  { %434 = vmatprep.subr.bf16.mxu0 %v448_v27 }
 0x1c7   :  { %412 = vmatmul.mubr.msk.f32.vlgmr.msra.gmra.mrb[0].mxu0 %vm142_vm12, %v452_v49 }
 0x1c8   :  { %436 = vmatpush3.bf16.msk.msra.mxu0 %vm435_vm13, %v451_v47  ;;  %425 = vmatprep.mubr.msk.f32.mxu0 %vm449_vm6, %v450_v28 }
 0x1cb   :  { %426 = vmatmul.mubr.msk.f32.vlgmr.msra.gmra.mrb[2].mxu0 %vm142_vm12, %v452_v49 }
 0x296   :  { %v282_v50 = vpop.f32.mrb[0].mxu1 }
 0x297   :  { %v357_v51 = vrot.slane %v282_v50, 7  ;;  %v420_v52 = vpop.f32.mrb[1].mxu1 }
 0x29a   :  { %v212_v53 = vpop.f32.mrb[0].mxu0 }
 0x29b   :  { %v363_v54 = vsel %vm362_vm14, %v212_v53, %v357_v51  ;;  %v413_v55 = vpop.f32.mrb[1].mxu0 }
 0x29e   :  { %v352_v56 = vpop.f32.mrb[2].mxu0 }
 0x29f   :  { %v360_v57 = vrot.slane %v352_v56, 6  ;;  %v427_v58 = vpop.f32.mrb[3].mxu0 }
 0x2a1   :  { %v365_v59 = vsel %vm364_vm15, %v363_v54, %v360_v57 }
 0x2a2   :  { %v437_v60 = vtrunc.f32 %v365_v59 }
 0x2a4   :  { %v438_v62 = vcvt.f32.s32 %v437_v60 }
 0x2a6   :  { %v368_v63 = vadd.s32 %v438_v62, %v366_v61 }
 0x2a8   :  { %370 = vst.msk [vmem:[%s515_s2] sm:$0x7] %vm59_vm3, %v368_v63 }

</bundles_post_ra>
